<compile_context>
chip_gen: v6e
topology: v6e:2x2x1
jax: 0.10.0
libtpu: 0.0.40
codegen_flags: <defaults>
</compile_context>

<pallas_src>
import jax
import jax.numpy as jnp
from jax.experimental import pallas as pl
from jax.experimental.pallas import tpu as pltpu


def _score_add_kernel(hs_ref, ms_ref, out_ref):
    # scores[i, j] = hs[i] + ms[j]   (hs already carries the folded bias).
    # (tm, 1) + (1, n) -> (tm, n): pure VPU broadcast add, lane-dense store.
    out_ref[...] = (hs_ref[...] + ms_ref[...]).astype(out_ref.dtype)


def fold_params(w_foh, b_foh, w_fom, b_fom, w_out, b_out):
    """Fold the three Linear layers.  Call ONCE at parameter-load time.

    Valid because this module applies no nonlinearity between
    (headfov + modfov) and outLayer, and outLayer is linear.
    """
    f32 = jnp.float32
    wo = w_out[0].astype(f32)                            # (hidden_units,)
    v_foh = w_foh.astype(f32).T @ wo                     # (2H,)
    v_fom = w_fom.astype(f32).T @ wo                     # (2H,)
    bias = wo @ b_foh.astype(f32) + wo @ b_fom.astype(f32) + b_out[0].astype(f32)
    return v_foh, v_fom, bias


def mst_parser_scores(x, v_foh, v_fom, bias, *, out_dtype=jnp.float32,
                      max_row_tile=256):
    """x: (n, 2*hidden_size) per-token BiLSTM states. Returns (n, n) scores."""
    n, _ = x.shape
    f32 = jnp.float32
    xf = x.astype(f32)

    # Per-token head / modifier contributions: one (n, 2H) x (2H, 2) matmul,
    # O(n*2H) work -- negligible next to the O(n^2) score matrix the kernel
    # writes.  Bias is folded into the head column, so the kernel needs no
    # scalar operand at all.
    v = jnp.stack([v_foh.astype(f32), v_fom.astype(f32)], axis=1)   # (2H, 2)
    hm = xf @ v                                                      # (n, 2)
    hs = (hm[:, 0] + bias).reshape(n, 1)                             # head col (+bias)
    ms = hm[:, 1].reshape(1, n)                                      # modifier row (lane-dense)

    # Row tiling: small / unaligned sentences -> single full-array block
    # (no padding, no slice); long 8-aligned sentences -> 8-aligned row tiles.
    if n <= max_row_tile or n % 8 != 0:
        tm = n
    else:
        tm = max_row_tile
    grid = (pl.cdiv(n, tm),)

    # VMEM budget: double-buffered out tile + (tiny) hs/ms blocks + headroom.
    # Only override the default scoped limit when we actually need more.
    vmem_needed = 4 * (2 * tm * n + 2 * tm + 2 * n) + (2 << 20)
    vmem_limit = int(min(vmem_needed, 64 << 20)) if vmem_needed > (16 << 20) else None

    out = pl.pallas_call(
        _score_add_kernel,
        out_shape=jax.ShapeDtypeStruct((n, n), out_dtype),
        grid=grid,
        in_specs=[
            pl.BlockSpec((tm, 1), lambda i: (i, 0)),   # head contribution column
            pl.BlockSpec((1, n), lambda i: (0, 0)),    # modifier row (grid-invariant)
        ],
        out_specs=pl.BlockSpec((tm, n), lambda i: (i, 0)),
        compiler_params=pltpu.CompilerParams(
            # On v7x, pltpu.CORE_PARALLEL would shard row tiles across the two
            # TensorCores; "parallel" is kept here for portability across
            # v5e/v6e/v7x.
            dimension_semantics=("parallel",),
            vmem_limit_bytes=vmem_limit,
        ),
    )(hs, ms)
    return out


def _linear_init(key, out_features, in_features):
    """Deterministic stand-in for nn.Linear default init (uniform +/- 1/sqrt(fan_in))."""
    kw, kb = jax.random.split(key)
    bound = 1.0 / jnp.sqrt(jnp.float32(in_features))
    w = jax.random.uniform(kw, (out_features, in_features), jnp.float32, -bound, bound)
    b = jax.random.uniform(kb, (out_features,), jnp.float32, -bound, bound)
    return w, b


if __name__ == "__main__":
    # Small shapes consistent with the module.
    seq = 8              # sentence length
    hidden_size = 32     # options.lstm_dims
    hidden_units = 32    # options.hidden_units
    dims2 = 2 * hidden_size

    key = jax.random.PRNGKey(0)
    k_x, k_foh, k_fom, k_out = jax.random.split(key, 4)

    # Per-token BiLSTM states (concat of sentence[i].lstms[0], lstms[1]).
    x = jax.random.normal(k_x, (seq, dims2), jnp.float32)

    # hidLayerFOH, hidLayerFOM: Linear(2*hidden_size -> hidden_units)
    w_foh, b_foh = _linear_init(k_foh, hidden_units, dims2)
    w_fom, b_fom = _linear_init(k_fom, hidden_units, dims2)
    # outLayer: Linear(hidden_units -> 1)
    w_out, b_out = _linear_init(k_out, 1, hidden_units)

    # TODO(synk): wlookup/plookup embeddings and forward_lstm (LSTMCell) are
    # declared in __init__ but never used inside forward(); not implemented.

    # Fold weights once (parameter-load time), then score one sentence.
    v_foh, v_fom, bias = fold_params(w_foh, b_foh, w_fom, b_fom, w_out, b_out)
    scores = mst_parser_scores(x, v_foh, v_fom, bias)
    scores = jax.block_until_ready(scores)

    # Pure-JAX reference mirroring the original (unfactorized) PyTorch math
    # (no activation between the headfov+modfov add and outLayer in this module).
    headfov_ref = x @ w_foh.T + b_foh
    modfov_ref = x @ w_fom.T + b_fom
    hid_ref = headfov_ref[:, None, :] + modfov_ref[None, :, :]
    scores_ref = hid_ref @ w_out[0] + b_out[0]

    assert scores.shape == (seq, seq)
    assert jnp.allclose(scores, scores_ref, rtol=1e-4, atol=1e-5), (
        float(jnp.max(jnp.abs(scores - scores_ref))))

    print("KERNEL_OK")
</pallas_src>

<mosaic_0001>
module attributes {stable_mosaic.version = 11 : i64} {
  func.func @_score_add_kernel(%arg0: i32, %arg1: memref<8x1xf32, #tpu.memory_space<vmem>>, %arg2: memref<1x8xf32, #tpu.memory_space<vmem>>, %arg3: memref<8x8xf32, #tpu.memory_space<vmem>>) attributes {dimension_semantics = [#tpu.dimension_semantics<parallel>], iteration_bounds = array<i64: 1>, scalar_prefetch = 0 : i64, scratch_operands = 0 : i64, tpu.core_type = #tpu.core_type<tc>, window_params = [{transform_indices = @transform_0, window_bounds = array<i64: 8, 1>}, {pipeline_mode = #tpu.pipeline_mode<synchronous>, transform_indices = @transform_1, window_bounds = array<i64: 1, 8>}, {transform_indices = @transform_2, window_bounds = array<i64: 8, 8>}]} {
    %c0 = arith.constant 0 : index
    %c0_0 = arith.constant 0 : index
    %0 = vector.load %arg1[%c0, %c0_0] : memref<8x1xf32, #tpu.memory_space<vmem>>, vector<8x1xf32>
    %c0_1 = arith.constant 0 : index
    %c0_2 = arith.constant 0 : index
    %1 = vector.load %arg2[%c0_1, %c0_2] : memref<1x8xf32, #tpu.memory_space<vmem>>, vector<1x8xf32>
    %2 = vector.broadcast %0 : vector<8x1xf32> to vector<8x8xf32>
    %3 = vector.broadcast %1 : vector<1x8xf32> to vector<8x8xf32>
    %4 = arith.addf %2, %3 : vector<8x8xf32>
    %c0_3 = arith.constant 0 : index
    %c0_4 = arith.constant 0 : index
    %5 = vector.load %arg3[%c0_3, %c0_4] : memref<8x8xf32, #tpu.memory_space<vmem>>, vector<8x8xf32>
    tpu.vector_store %arg3[%c0_3, %c0_4], %4 {strides = array<i32>} : memref<8x8xf32, #tpu.memory_space<vmem>>, vector<8x8xf32>,
    return
  }
  func.func @transform_0(%arg0: i32) -> (i32, i32) {
    %c0_i32 = arith.constant 0 : i32
    %c0_i32_0 = arith.constant 0 : i32
    return %arg0, %c0_i32 : i32, i32
  }
  func.func @transform_1(%arg0: i32) -> (i32, i32) {
    %c0_i32 = arith.constant 0 : i32
    %c0_i32_0 = arith.constant 0 : i32
    %c0_i32_1 = arith.constant 0 : i32
    return %c0_i32, %c0_i32_0 : i32, i32
  }
  func.func @transform_2(%arg0: i32) -> (i32, i32) {
    %c0_i32 = arith.constant 0 : i32
    %c0_i32_0 = arith.constant 0 : i32
    return %arg0, %c0_i32 : i32, i32
  }
}

</mosaic_0001>

<bundles_post_ra>
// kernel: tpu_custom_call.1
= control target key start
LH: loop header
LB: loop body
LE: loop exit
PB: predicated region body
PF: predicated region fallthrough
CT: control target
= control target key end

     0   :  { %s94_s0 = inlined_call_operand.vmem [shape: f32[8,1], index: 0, kind: input, shape index: {}]   ;;  %s95_s1 = inlined_call_operand.vmem [shape: f32[1,8], index: 1, kind: input, shape index: {}]   ;;  %s96_s2 = inlined_call_operand.hbm [shape: f32[8,8], index: 2, kind: output, shape index: {}]  }
   0x1   :  { %v12_v0 = vld [vmem:[%s94_s0] sm:$0xff] }
   0x2   :  { %7 = vsyncpa [#allocation3], 0  ;;  %v68_v1 = vmov 0   ;;  %v42_v2 = vld [vmem:[%s95_s1] ss:$0 sm:$0xff]  ;;  %s69_s13 = smov [#allocation2]  }
   0x3   :  { %45 = vset.pattern.permute.xlu0 %v68_v1  ;;  %s34_s14 = sshll.u32 %s69_s13, 4  ;;  %vm26_vm0 = vcmask 64512   ;;  %s35_s14 = int_to_ptr.vmem [resolvable:$true] %s34_s14 }
   0x4   :  { %16 = vperm.xlu0 %45, %v12_v0   ;;  %s46_s15 = scalar_lea.vmem %s35_s14, 128  ;;  %p51_p1 = scmp.lt.s32.totalorder %s35_s14, %s35_s14 }
   0x5   :  { %p47_p0 = scmp.ne.s32.totalorder %s35_s14, %s46_s15  ;;  %p52_p2 = scmp.lt.s32.totalorder %s46_s15, %s46_s15 }
   0x7   :  { %p53_p3 = por %p52_p2, %p51_p1 }
   0x9   :  { %p54_p4 = pnand %p53_p3, %p47_p0 }
  0x7f   :  { %v17_v3 = vpop.permute.xlu0 %16 }
  0x80   :  { %v25_v4 = vadd.f32 %v42_v2, %v17_v3 }
  0x82   :  { %27 = vst.msk [vmem:[#allocation2] sm:$0xff] %vm26_vm0, %v25_v4 }
  0x83   :  { %57 = shalt.err (!%p54_p4)
}
  0x84   :  { %37 = dma.vmem_to_hbm [thread:$0]  %s35_s14, 128, %s96_s2, [#allocation3]  }
  0x85   :  { %66 = dma.done.wait [#allocation3], 128  }
  0x86   :  { %67 = vsyncadd [#allocation3], 4294967168 }
  0x87   :  { %41 = vsyncpa [#allocation3], 1 }

</bundles_post_ra>
